<compile_context>
chip_gen: v6e
topology: v6e:2x2x1
jax: 0.10.0
libtpu: 0.0.40
codegen_flags: <defaults>
</compile_context>

<pallas_src>
import functools
import math

import jax
import jax.numpy as jnp
from jax.experimental import pallas as pl
from jax.experimental.pallas import tpu as pltpu


def _round_up(n: int, m: int) -> int:
    return ((n + m - 1) // m) * m


def _positional_table(length: int, d_model: int) -> jnp.ndarray:
    """Sinusoidal table matching PositionalEmbedding.__init__ (even d_model)."""
    position = jnp.arange(length, dtype=jnp.float32)[:, None]
    div_term = jnp.exp(
        jnp.arange(0, d_model, 2, dtype=jnp.float32)
        * -(math.log(10000.0) / d_model)
    )
    pe = jnp.zeros((length, d_model), dtype=jnp.float32)
    pe = pe.at[:, 0::2].set(jnp.sin(position * div_term))
    pe = pe.at[:, 1::2].set(jnp.cos(position * div_term)[:, : d_model // 2])
    return pe


def _embed_kernel(seed_ref, x_ref, w_ref, pe_ref, o_ref, *,
                  dropout_p: float, training: bool):
    # x_ref  : (1, ts, 3*c_in)  -- [x[t-1] | x[t] | x[t+1]] along channels
    # w_ref  : (3*c_in, d_model)
    # pe_ref : (ts, d_model)    -- positional rows for this seq tile
    # o_ref  : (1, ts, d_model)
    acc = jnp.dot(x_ref[0], w_ref[...], preferred_element_type=jnp.float32)
    acc = acc + pe_ref[...]

    if training and dropout_p > 0.0:
        if dropout_p >= 1.0:
            acc = jnp.zeros_like(acc)
        else:
            # Fused inverted dropout via the TPU hardware PRNG (statistically
            # equivalent to torch dropout; bit patterns differ from torch RNG).
            # NOTE: TPU-hardware-only -- prng_seed has no CPU/interpret lowering.
            pltpu.prng_seed(
                seed_ref[0]
                + pl.program_id(0) * pl.num_programs(1)
                + pl.program_id(1)
            )
            bits = pltpu.bitcast(pltpu.prng_random_bits(acc.shape), jnp.uint32)
            thresh = jnp.uint32(int(dropout_p * float(1 << 32)))
            keep = bits >= thresh
            acc = jnp.where(keep, acc * (1.0 / (1.0 - dropout_p)), 0.0)

    o_ref[0] = acc.astype(o_ref.dtype)


def _pick_seq_tile(S: int, seq_cap: int, batch: int, min_steps: int = 4):
    """Largest multiple of 8 that divides S, <= seq_cap, giving >= min_steps
    total grid steps when possible.  Returns None if S has no such divisor."""
    upper = min(seq_cap, S)
    upper -= upper % 8
    cands = [t for t in range(upper, 7, -8) if S % t == 0]
    if not cands:
        return None
    for t in cands:                       # descending -> largest tile first
        if batch * (S // t) >= min_steps:
            return t
    return cands[0]                       # too small to reach min_steps anyway


def data_embedding_wo_temp(x, conv_w, pe, x_mark=None, *, dropout_p: float = 0.1,
                           training: bool = False, seed: int = 0,
                           seq_block: int = 1024, out_dtype=jnp.float32):
    """x: (B, S, c_in) f32; conv_w: (d_model, c_in, 3); pe: (max_len>=S, d_model).

    Returns (B, S, d_model).  x_mark is accepted and ignored, matching the
    PyTorch DataEmbedding_wo_temp.forward.
    """
    del x_mark
    B, S, c_in = x.shape
    d_model = conv_w.shape[0]
    assert conv_w.shape == (d_model, c_in, 3)
    assert pe.shape[0] >= S and pe.shape[1] == d_model

    # --- prep on the tiny (B, S, c_in) input ---------------------------------
    # Circular conv as one K = 3*c_in matmul:
    #   out[t] = W0 @ x[(t-1)%S] + W1 @ x[t] + W2 @ x[(t+1)%S]
    x_f = x.astype(jnp.float32)
    x_cat = jnp.concatenate(
        [jnp.roll(x_f, 1, axis=1), x_f, jnp.roll(x_f, -1, axis=1)], axis=-1)
    w_cat = jnp.transpose(conv_w, (2, 1, 0)).astype(jnp.float32)
    w_cat = w_cat.reshape(3 * c_in, d_model)
    pe_s = pe[:S].astype(jnp.float32)

    # --- seq tiling -----------------------------------------------------------
    # Cap the tile so double-buffered pe + out (+ input) tiles stay well under
    # the smallest default scoped-VMEM limit (16 MiB on v5e, 32 MiB on v6e/v7x).
    bytes_per_row = 4 * (2 * d_model + 2 * d_model + 2 * 3 * c_in)
    seq_cap = max(8, min(seq_block, (12 << 20) // max(bytes_per_row, 1)))
    ts = _pick_seq_tile(S, seq_cap, B)

    padded = ts is None
    if padded:
        # S not a multiple of 8: fall back to pad + trailing slice (pays one
        # extra output copy; only hit for irregular sequence lengths).
        ts_cap = max(8, seq_cap - seq_cap % 8)
        ts = min(_round_up(S, 8), ts_cap)
        s_total = pl.cdiv(S, ts) * ts
        pad = s_total - S
        x_cat = jnp.pad(x_cat, ((0, 0), (0, pad), (0, 0)))
        pe_s = jnp.pad(pe_s, ((0, pad), (0, 0)))
    else:
        s_total = S

    num_s = s_total // ts
    grid = (num_s, B)  # s outer, b inner -> pe tile re-used across the batch
    seed_arr = jnp.array([seed], dtype=jnp.int32)

    kernel = functools.partial(_embed_kernel,
                               dropout_p=float(dropout_p),
                               training=bool(training))

    out = pl.pallas_call(
        kernel,
        out_shape=jax.ShapeDtypeStruct((B, s_total, d_model), out_dtype),
        grid_spec=pltpu.PrefetchScalarGridSpec(
            num_scalar_prefetch=1,
            grid=grid,
            in_specs=[
                pl.BlockSpec((1, ts, 3 * c_in), lambda s, b, seed: (b, s, 0)),
                pl.BlockSpec((3 * c_in, d_model), lambda s, b, seed: (0, 0)),
                pl.BlockSpec((ts, d_model), lambda s, b, seed: (s, 0)),
            ],
            out_specs=pl.BlockSpec((1, ts, d_model), lambda s, b, seed: (b, s, 0)),
        ),
        compiler_params=pltpu.CompilerParams(
            dimension_semantics=("parallel", "parallel"),
        ),
    )(seed_arr, x_cat, w_cat, pe_s)

    if padded:
        out = out[:, :S, :]
    return out


if __name__ == "__main__":
    # Small shapes consistent with the module: batch=2, seq=32, c_in=8,
    # d_model=128 (lane-dense output).
    B, S, c_in, d_model = 2, 32, 8, 128
    max_len = 64

    key = jax.random.PRNGKey(0)
    kx, kw, km = jax.random.split(key, 3)
    x = jax.random.normal(kx, (B, S, c_in), dtype=jnp.float32)
    x_mark = jax.random.normal(km, (B, S, 4), dtype=jnp.float32)  # ignored
    conv_w = jax.random.normal(kw, (d_model, c_in, 3), dtype=jnp.float32) * math.sqrt(
        2.0 / (c_in * 3))
    pe = _positional_table(max_len, d_model)

    # Eval-mode forward (dropout = identity).  The fused train-mode dropout
    # path uses the TPU hardware PRNG and is only runnable on real TPU
    # hardware (no CPU/interpret lowering), so it is not exercised here.
    out = data_embedding_wo_temp(x, conv_w, pe, x_mark,
                                 dropout_p=0.1, training=False)
    out = jax.block_until_ready(out)

    hi = jax.lax.Precision.HIGHEST
    xp = jnp.roll(x, 1, axis=1)
    xn = jnp.roll(x, -1, axis=1)
    ref = (
        jnp.dot(xp, conv_w[:, :, 0].T, precision=hi)
        + jnp.dot(x, conv_w[:, :, 1].T, precision=hi)
        + jnp.dot(xn, conv_w[:, :, 2].T, precision=hi)
        + pe[None, :S, :]
    )
    assert out.shape == (B, S, d_model)
    assert jnp.allclose(out, ref, atol=1e-2, rtol=1e-2), "mismatch vs reference"

    print("KERNEL_OK")
</pallas_src>

<mosaic_0001>
module attributes {stable_mosaic.version = 11 : i64} {
  func.func @_embed_kernel(%arg0: i32, %arg1: i32, %arg2: memref<1xi32, #tpu.memory_space<smem>>, %arg3: memref<1x16x24xf32, #tpu.memory_space<vmem>>, %arg4: memref<24x128xf32, #tpu.memory_space<vmem>>, %arg5: memref<16x128xf32, #tpu.memory_space<vmem>>, %arg6: memref<1x16x128xf32, #tpu.memory_space<vmem>>) attributes {dimension_semantics = [#tpu.dimension_semantics<parallel>, #tpu.dimension_semantics<parallel>], iteration_bounds = array<i64: 2, 2>, scalar_prefetch = 1 : i64, scratch_operands = 0 : i64, tpu.core_type = #tpu.core_type<tc>, window_params = [{transform_indices = @transform_0, window_bounds = array<i64: 1, 16, 24>}, {pipeline_mode = #tpu.pipeline_mode<synchronous>, transform_indices = @transform_1, window_bounds = array<i64: 24, 128>}, {transform_indices = @transform_2, window_bounds = array<i64: 16, 128>}, {transform_indices = @transform_3, window_bounds = array<i64: 1, 16, 128>}]} {
    %c0 = arith.constant 0 : index
    %c0_0 = arith.constant 0 : index
    %c0_1 = arith.constant 0 : index
    %0 = vector.load %arg3[%c0, %c0_0, %c0_1] : memref<1x16x24xf32, #tpu.memory_space<vmem>>, vector<1x16x24xf32>
    %1 = vector.shape_cast %0 : vector<1x16x24xf32> to vector<16x24xf32>
    %c0_2 = arith.constant 0 : index
    %c0_3 = arith.constant 0 : index
    %2 = vector.load %arg4[%c0_2, %c0_3] : memref<24x128xf32, #tpu.memory_space<vmem>>, vector<24x128xf32>
    %cst = arith.constant dense<0.000000e+00> : vector<16x128xf32>
    %3 = tpu.matmul %1, %2, %cst {dimension_numbers = #tpu.dot_dimension_numbers<[1], [0], [0], [1], [0, 0, 1, 1], [], []>} : vector<16x24xf32>, vector<24x128xf32>, vector<16x128xf32> -> vector<16x128xf32>
    %c0_4 = arith.constant 0 : index
    %c0_5 = arith.constant 0 : index
    %4 = vector.load %arg5[%c0_4, %c0_5] : memref<16x128xf32, #tpu.memory_space<vmem>>, vector<16x128xf32>
    %5 = arith.addf %3, %4 : vector<16x128xf32>
    %c0_6 = arith.constant 0 : index
    %c0_7 = arith.constant 0 : index
    %c0_8 = arith.constant 0 : index
    %6 = vector.load %arg6[%c0_6, %c0_7, %c0_8] : memref<1x16x128xf32, #tpu.memory_space<vmem>>, vector<1x16x128xf32>
    %7 = vector.shape_cast %6 : vector<1x16x128xf32> to vector<16x128xf32>
    %8 = vector.shape_cast %5 : vector<16x128xf32> to vector<1x16x128xf32>
    tpu.vector_store %arg6[%c0_6, %c0_7, %c0_8], %8 {strides = array<i32>} : memref<1x16x128xf32, #tpu.memory_space<vmem>>, vector<1x16x128xf32>,
    return
  }
  func.func @transform_0(%arg0: i32, %arg1: i32, %arg2: memref<1xi32, #tpu.memory_space<smem>>) -> (i32, i32, i32) {
    %c0_i32 = arith.constant 0 : i32
    %c0_i32_0 = arith.constant 0 : i32
    return %arg1, %arg0, %c0_i32 : i32, i32, i32
  }
  func.func @transform_1(%arg0: i32, %arg1: i32, %arg2: memref<1xi32, #tpu.memory_space<smem>>) -> (i32, i32) {
    %c0_i32 = arith.constant 0 : i32
    %c0_i32_0 = arith.constant 0 : i32
    %c0_i32_1 = arith.constant 0 : i32
    return %c0_i32, %c0_i32_0 : i32, i32
  }
  func.func @transform_2(%arg0: i32, %arg1: i32, %arg2: memref<1xi32, #tpu.memory_space<smem>>) -> (i32, i32) {
    %c0_i32 = arith.constant 0 : i32
    %c0_i32_0 = arith.constant 0 : i32
    return %arg0, %c0_i32 : i32, i32
  }
  func.func @transform_3(%arg0: i32, %arg1: i32, %arg2: memref<1xi32, #tpu.memory_space<smem>>) -> (i32, i32, i32) {
    %c0_i32 = arith.constant 0 : i32
    %c0_i32_0 = arith.constant 0 : i32
    return %arg1, %arg0, %c0_i32 : i32, i32, i32
  }
}

</mosaic_0001>

<bundles_post_ra>
// kernel: tpu_custom_call.1
= control target key start
LH: loop header
LB: loop body
LE: loop exit
PB: predicated region body
PF: predicated region fallthrough
CT: control target
= control target key end

     0   :  { %s802_s0 = inlined_call_operand.<no memory space> [shape: s32[1], index: 0, kind: input, shape index: {}]   ;;  %s803_s1 = inlined_call_operand.vmem [shape: f32[2,32,24], index: 1, kind: input, shape index: {}]   ;;  %s804_s2 = inlined_call_operand.vmem [shape: f32[24,128], index: 2, kind: input, shape index: {}]   ;;  %s805_s3 = inlined_call_operand.vmem [shape: f32[32,128], index: 3, kind: input, shape index: {}]   ;;  %s806_s4 = inlined_call_operand.hbm [shape: f32[2,32,128], index: 4, kind: output, shape index: {}]  }
   0x1   :  { %808 = sst [smem:[#allocation8_spill]] %s804_s2 }
   0x2   :  { %10 = vsyncpa [#allocation5], 0 }
   0x3   :  { %12 = vsyncpa [#allocation5 + $0x1], 0  ;;  %s653_s15 = smov 0   ;;  %s655_s16 = smov 0  }
   0x4   :  { %s657_s17 = smov 0   ;;  %s659_s0 = smov 0  }
   0x5   :  { %s661_s18 = smov 0   ;;  %s663_s19 = smov 0  }
   0x6   :  { %s665_s20 = smov 0   ;;  %s667_s21 = smov 0  }
   0x7 LB: > { %s425_s22 = sadd.s32 4294967295, %s623_s21   ;;  %s426_s23 = sadd.s32 4294967294, %s623_s21   ;;  %s623_s21 = sphi %s667_s21, %s18_s21   ;;  %s619_s20 = sphi %s665_s20, %s820_s20   ;;  %s615_s19 = sphi %s663_s19, %s819_s19   ;;  %s611_s18 = sphi %s661_s18, %s818_s18   ;;  %s607_s0 = sphi %s659_s0, %s817_s0   ;;  %s603_s17 = sphi %s657_s17, %s816_s17   ;;  %s599_s16 = sphi %s655_s16, %s815_s16   ;;  %s595_s15 = sphi %s653_s15, %s814_s15  }
   0x8   : > { %s27_s24 = sadd.s32 1, %s615_s19  ;;  %s30_s25 = sadd.s32 1, %s619_s20 }
   0x9   : > { %p28_p0 = scmp.ge.s32.totalorder %s27_s24, 2  ;;  %p124_p1 = scmp.ne.s32.totalorder %s603_s17, %s599_s16 }
   0xa   : > { %p125_p2 = scmp.eq.s32.totalorder %s425_s22, 3  ;;  %p130_p5 = scmp.ne.s32.totalorder %s599_s16, %s595_s15 }
   0xb   : > { %s822_s24 = smov (%p28_p0, %s27_s24), 0  ;;  %s824_s25 = smov (!%p28_p0, %s30_s25), %s619_s20 }
   0xc   : > { %s109_s26 = ssub.s32 %s615_s19, %s822_s24  ;;  %p704_p3 = por %p125_p2, %p124_p1 }
   0xd   : > { %p32_p4 = scmp.ge.s32.totalorder %s824_s25, 2  ;;  %p131_p6 = scmp.eq.s32.totalorder %s426_s23, 3 }
   0xe   : > { %p429_p7 = scmp.ge.s32.totalorder %s623_s21, 1  ;;  %p174_p9 = scmp.lt.s32.totalorder %s623_s21, 5 }
   0xf   : > { %s826_s25 = smov (%p32_p4, %s824_s25), 0  ;;  %p713_p8 = por %p131_p6, %p130_p5 }
  0x10   : > { %810 = sst [smem:[#allocation7_spill]] %s826_s25  ;;  %s110_s29 = ssub.s32 %s619_s20, %s826_s25 }
  0x11   : > { %s114_s30 = sadd.s32 1, %s603_s17  ;;  %s111_s5 = sor.u32 %s110_s29, %s109_s26 }
  0x12   : > { %p175_p10 = pnand %p429_p7, %p174_p9  ;;  %p112_p11 = scmp.eq.s32.totalorder %s111_s5, 0 }
  0x13   : > { %s812_s2 = sld [smem:[#allocation8_spill]] (!%p175_p10)  ;;  %s431_s11 = sshll.u32 (!%p175_p10), %s611_s18, 1 }
  0x14   : > { %s722_s6 = scalar_select %p112_p11, %s603_s17, %s114_s30  }
  0x15   : > { %178 = sbr.rel (%p175_p10) target bundleno = 245 (0xf5), region = 32  ;;  %p208_p12 = scmp.lt.s32.totalorder (!%p175_p10), %s607_s0, 1 }
  0x16   : > { %p210_p13 = scmp.lt.s32.totalorder (!%p175_p10), %s431_s11, 3  ;;  %s204_s7 = sand.u32 (!%p175_p10), 1, %s599_s16  }
  0x17   : > { %s440_s8 = sshll.u32 (!%p175_p10), %s607_s0, 2  ;;  %s430_s10 = sshll.u32 (!%p175_p10), %s204_s7, 4 }
  0x18   : > { %s328_s12 = sadd.s32 (!%p175_p10), %s440_s8, %s431_s11 }
  0x1a   : > { %v228_v0 = vld [vmem:[%s812_s2 + $0x10] sm:$0xff]  ;;  %v227_v1 = vld [vmem:[%s812_s2 + $0x8] sm:$0xff]  ;;  %v226_v2 = vld [vmem:[%s812_s2] sm:$0xff]  ;;  %s209_s14 = scalar_select %p208_p12, %s607_s0, 1  ;;  %vm231_vm0 = vcmask 195584  }
  0x1b   : > { %449 = vmatprep.subr.mxu0 %v228_v0  ;;  %s211_s22 = scalar_select %p210_p13, %s431_s11, 3 }
  0x1c   : > { %450 = vmatpush3.msra.mxu0 %v228_v0  ;;  %s432_s23 = sshll.u32 %s209_s14, 2  ;;  %s441_s2 = sshll.u32 %s328_s12, 7 }
  0x1d   : > { %451 = vmatprep.subr.mxu0 %v227_v1  ;;  %s213_s26 = sadd.s32 %s432_s23, %s211_s22  ;;  %s435_s9 = sshll.u32 %s211_s22, 3 }
  0x1e   : > { %452 = vmatpush3.msra.mxu0 %v227_v1  ;;  %s433_s29 = sshll.u32 %s213_s26, 3  ;;  %s221_s23 = scalar_lea.vmem %s805_s3, %s435_s9 }
  0x1f   : > { %453 = vmatprep.subr.mxu0 %v226_v2  ;;  %s215_s5 = scalar_lea.vmem %s803_s1, %s433_s29  ;;  %v230_v5 = vld [vmem:[%s221_s23 + $0x8] sm:$0xff]  ;;  %s206_s26 = scalar_lea.vmem [#allocation4], %s430_s10  ;;  %v229_v7 = vld [vmem:[%s221_s23] sm:$0xff] }
  0x20   : > { %454 = vmatpush3.msra.mxu0 %v226_v2  ;;  %v224_v3 = vld [vmem:[%s215_s5] sm:$0xff]  ;;  %v225_v4 = vld [vmem:[%s215_s5 + $0x8] sm:$0xff]  ;;  %s331_s25 = sshll.u32 %s206_s26, 4  ;;  %s747_s30 = scalar_lea.hbm %s806_s4, %s441_s2  ;;  %s749_s25 = int_to_ptr.vmem [resolvable:$true] %s331_s25 }
  0x21   : > { %455 = vmatprep.mubr.msk.f32.mxu0 %vm231_vm0, %v224_v3  ;;  %s751_s0 = scalar_lea.sflag [#allocation5], %s204_s7  ;;  %s531_s11 = scalar_lea.vmem %s749_s25, 256 }
  0x22   : > { %456 = vmatmul.mubr.msk.f32.vlgmr.msra.gmra.mxu0 %vm231_vm0, %v225_v4  ;;  %p532_p0 = scmp.ne.s32.totalorder %s749_s25, %s531_s11  ;;  %s625_s22 = smov [#allocation4]  }
  0x23   : > { %s535_s2 = sshll.u32 %s625_s22, 4  ;;  %s536_s2 = int_to_ptr.vmem [resolvable:$false] %s535_s2 }
  0x24   : > { %p533_p1 = pnand %p532_p0, %p704_p3  ;;  %s537_s5 = scalar_lea.vmem %s536_s2, 512 }
  0x25   : > { %p538_p4 = scmp.lt.s32.totalorder %s749_s25, %s536_s2  ;;  %p539_p5 = scmp.lt.s32.totalorder %s537_s5, %s531_s11 }
  0x26   : > { %p534_p2 = pneg %p533_p1 }
  0x27   : > { %p540_p6 = por %p539_p5, %p538_p4 }
  0x29   : > { %p541_p7 = pnand %p540_p6, %p534_p2 }
  0xe2   : > { %v457_v6 = vpop.f32.mrf.mxu0 }
  0xe3   : > { %v310_v8 = vadd.f32 %v457_v6, %v230_v5 }
  0xe4   : > { %v304_v9 = vpop.f32.mrf.mxu0 }
  0xe5   : > { %314 = vst [vmem:[%s206_s26 + $0x8] sm:$0xff] %v310_v8  ;;  %v305_v10 = vadd.f32 %v304_v9, %v229_v7 }
  0xe7   : > { %313 = vst [vmem:[%s206_s26] sm:$0xff] %v305_v10 }
  0xe8   : > { %544 = shalt.err (!%p541_p7)
}
  0xe9   : > { %s545_s7 = scalar_lea.hbm %s747_s30, 256  ;;  %s549_s10 = scalar_lea.hbm %s806_s4, 1024 }
  0xea   : > { %p546_p9 = scmp.ne.s32.totalorder %s747_s30, %s545_s7  ;;  %p550_p12 = scmp.lt.s32.totalorder %s747_s30, %s806_s4 }
  0xeb   : > { %p551_p13 = scmp.lt.s32.totalorder %s549_s10, %s545_s7 }
  0xec   : > { %p547_p10 = pnand %p546_p9, %p704_p3 }
  0xed   : > { %p552_p0 = por %p551_p13, %p550_p12 }
  0xee   : > { %p548_p11 = pneg %p547_p10 }
  0xf0   : > { %p553_p1 = pnand %p552_p0, %p548_p11 }
  0xf2   : > { %556 = shalt.err (!%p553_p1)
}
  0xf3   : > { %s626_s14 = smov 128   ;;  %s627_s23 = smov 8  }
  0xf4   : > { %458 = dma.vmem_to_hbm [thread:$0]  (%p704_p3), %s749_s25, 256, %s747_s30, %s751_s0, %s626_s14, %s626_s14, %s627_s23  }
  0xf5 PF: > { %p464_p2 = scmp.ge.s32.totalorder %s623_s21, 2  ;;  %s346_s26 = sand.u32 1, %s595_s15  }
  0xf6   : > { %s347_s29 = scalar_lea.sflag [#allocation5], %s346_s26 }
  0xf7   : > { %p461_p4 = pnand %p464_p2, %p713_p8 }
  0xf9   : > { %p462_p5 = pneg %p461_p4 }
  0xfb   : > { %590 = dma.done.wait (%p462_p5), %s347_s29, 256  }
  0xfc   : > { %592 = vsyncadd (%p462_p5), %s347_s29, 4294967040  ;;  %s18_s21 = sadd.s32 1, %s623_s21   ;;  %s813_s25 = sld [smem:[#allocation7_spill]] }
  0xfd   : > { %p15_p6 = scmp.ge.s32.totalorder %s18_s21, 6   ;;  %s814_s15 = smov %s599_s16 }
  0xfe   : > { %s815_s16 = smov %s603_s17  ;;  %s816_s17 = smov %s722_s6 }
  0xff   : > { %s817_s0 = smov %s615_s19  ;;  %s818_s18 = smov %s619_s20 }
 0x100   : > { %s819_s19 = smov %s822_s24  ;;  %17 = sbr.rel (!%p15_p6) target bundleno = 7 (0x7), region = 70 }
 0x102   : > { %s820_s20 = smov %s813_s25 }
 0x105   :  { %352 = vsyncpa [#allocation5], 1 }
 0x106   :  { %354 = vsyncpa [#allocation5 + $0x1], 1 }

</bundles_post_ra>
